<compile_context>
chip_gen: v7x
topology: tpu7x:2x2x1
jax: 0.10.0
libtpu: 0.0.40
codegen_flags: <defaults>
</compile_context>

<pallas_src>
import functools

import jax
import jax.numpy as jnp
from jax.experimental import pallas as pl
from jax.experimental.pallas import tpu as pltpu


def _decoder_kernel(H, L,
                    tok_ref,          # (T,) int32 scalar-prefetch (SMEM); used by index_maps only
                    emb_ref,          # (1, E)      bf16  gathered embedding row for this step
                    w_cat_ref,        # (L, E+H, 4H) bf16 fused [W_ih^T ; W_hh^T]
                    b_ref,            # (L, 4H)     f32   b_ih + b_hh
                    h0_ref,           # (L, H)      f32   initial hidden
                    c0_ref,           # (L, H)      f32   initial cell
                    w_out_ref,        # (H, V)      bf16  output projection (pre-transposed)
                    b_out_ref,        # (1, V)      f32
                    logp_ref,         # (1, V)      f32   out: log-probs for this step
                    h_out_ref,        # (L, H)      f32   out: hidden, carried across steps
                    c_out_ref):       # (L, H)      f32   out: cell,   carried across steps
    del tok_ref
    t = pl.program_id(0)

    # First step: seed the carried state. The h/c output blocks have constant
    # index_maps, so they stay VMEM-resident across the whole grid.
    @pl.when(t == 0)
    def _():
        h_out_ref[...] = h0_ref[...]
        c_out_ref[...] = c0_ref[...]

    # relu(dropout(embedding(token)))  -- dropout is identity in eval mode.
    x = jnp.maximum(emb_ref[...].astype(jnp.float32), 0.0)          # (1, E)

    for l in range(L):                                               # L is tiny & static
        h = h_out_ref[pl.ds(l, 1), :]                                # (1, H) prev-step state
        c = c_out_ref[pl.ds(l, 1), :]                                # (1, H)
        # Fused input+recurrent matmul on the MXU (bf16 in, f32 accumulate).
        xc = jnp.concatenate([x, h], axis=1).astype(jnp.bfloat16)    # (1, E+H)
        gates = (jnp.dot(xc, w_cat_ref[l], preferred_element_type=jnp.float32)
                 + b_ref[pl.ds(l, 1), :])                            # (1, 4H) f32
        # PyTorch gate order i, f, g, o; slices are lane-aligned when H % 128 == 0.
        i_g = jax.nn.sigmoid(gates[:, 0 * H:1 * H])
        f_g = jax.nn.sigmoid(gates[:, 1 * H:2 * H])
        g_g = jnp.tanh(gates[:, 2 * H:3 * H])
        o_g = jax.nn.sigmoid(gates[:, 3 * H:4 * H])
        c_new = f_g * c + i_g * g_g
        h_new = o_g * jnp.tanh(c_new)
        h_out_ref[pl.ds(l, 1), :] = h_new
        c_out_ref[pl.ds(l, 1), :] = c_new
        x = h_new                                                    # inter-layer dropout: identity

    # log_softmax(Linear(h_top)), numerically stable.
    logits = (jnp.dot(x.astype(jnp.bfloat16), w_out_ref[...],
                      preferred_element_type=jnp.float32)
              + b_out_ref[...])                                      # (1, V)
    m = jnp.max(logits, axis=1, keepdims=True)
    z = logits - m
    lse = jnp.log(jnp.sum(jnp.exp(z), axis=1, keepdims=True))
    logp_ref[...] = z - lse


def decoder_rnn_forward(tokens, hidden, params):
    """Teacher-forced decode of T tokens with one pallas_call (weights loaded once).

    tokens : int32 array (T,)
    hidden : (h0, c0), each (num_layers, 1, H)   (PyTorch LSTM convention)
    returns: (log_probs (T, V), (h_T, c_T) each (num_layers, 1, H))
    T == 1 reproduces a single DecoderRNN.forward step exactly.
    """
    emb_tbl = params["embedding"]                # (V, E)       bf16
    w_cat = params["w_cat"]                      # (L, E+H, 4H) bf16
    b_lstm = params["b_lstm"]                    # (L, 4H)      f32
    w_out_t = params["w_out_t"]                  # (H, V)       bf16
    b_out = params["b_out"]                      # (1, V)       f32

    V, E = emb_tbl.shape
    L, EH, H4 = w_cat.shape
    H = H4 // 4
    # The recurrent feedback (x <- h) and the fused weight layout require E == H.
    assert EH == E + H and E == H, "DecoderRNN kernel requires embedding_size == hidden_size"
    T = int(tokens.shape[0])

    h0, c0 = hidden
    h0_2d = h0.reshape(L, H).astype(jnp.float32)
    c0_2d = c0.reshape(L, H).astype(jnp.float32)
    # (V, 1, E) so the gathered row uses a (None, 1, E) block (full last-two dims).
    emb_3d = emb_tbl.reshape(V, 1, E)

    kernel = functools.partial(_decoder_kernel, H, L)

    grid_spec = pltpu.PrefetchScalarGridSpec(
        num_scalar_prefetch=1,
        grid=(T,),
        in_specs=[
            # per-step embedding row gather via scalar-prefetched token ids
            pl.BlockSpec((None, 1, E), lambda t, tok: (tok[t], 0, 0)),
            # weights: constant index_maps -> DMA'd once, resident for all T steps
            pl.BlockSpec((L, E + H, 4 * H), lambda t, tok: (0, 0, 0)),
            pl.BlockSpec((L, 4 * H), lambda t, tok: (0, 0)),
            pl.BlockSpec((L, H), lambda t, tok: (0, 0)),
            pl.BlockSpec((L, H), lambda t, tok: (0, 0)),
            pl.BlockSpec((H, V), lambda t, tok: (0, 0)),
            pl.BlockSpec((1, V), lambda t, tok: (0, 0)),
        ],
        out_specs=[
            pl.BlockSpec((None, 1, V), lambda t, tok: (t, 0, 0)),    # per-step log-probs
            pl.BlockSpec((L, H), lambda t, tok: (0, 0)),             # carried h (written back once)
            pl.BlockSpec((L, H), lambda t, tok: (0, 0)),             # carried c (written back once)
        ],
    )

    flops = T * (L * 2 * (E + H) * 4 * H + 2 * H * V + 5 * V)
    transcendentals = T * (L * 5 * H + V)
    bytes_accessed = (2 * L * (E + H) * 4 * H          # w_cat   (bf16)
                      + 2 * H * V                      # w_out_t (bf16)
                      + 2 * T * E                      # gathered embedding rows (bf16)
                      + 4 * (L * 4 * H + V + 2 * L * H)  # biases + initial state (f32)
                      + 4 * (T * V + 2 * L * H))       # outputs (f32)

    logp, h_new, c_new = pl.pallas_call(
        kernel,
        grid_spec=grid_spec,
        out_shape=(
            jax.ShapeDtypeStruct((T, 1, V), jnp.float32),
            jax.ShapeDtypeStruct((L, H), jnp.float32),
            jax.ShapeDtypeStruct((L, H), jnp.float32),
        ),
        compiler_params=pltpu.CompilerParams(
            dimension_semantics=("arbitrary",)),       # state carried across grid steps
        cost_estimate=pl.CostEstimate(
            flops=flops, transcendentals=transcendentals,
            bytes_accessed=bytes_accessed),
    )(tokens, emb_3d, w_cat, b_lstm, h0_2d, c0_2d, w_out_t, b_out)

    return logp.reshape(T, V), (h_new.reshape(L, 1, H), c_new.reshape(L, 1, H))


def _reference_forward(tokens, hidden, params):
    """Pure-JAX reference mirroring the kernel's math (bf16 weights, f32 gate math)."""
    emb_tbl = params["embedding"]
    w_cat = params["w_cat"]
    b_lstm = params["b_lstm"]
    w_out_t = params["w_out_t"]
    b_out = params["b_out"]
    L, _, H4 = w_cat.shape
    H = H4 // 4

    h = hidden[0].reshape(L, H).astype(jnp.float32)
    c = hidden[1].reshape(L, H).astype(jnp.float32)
    logps = []
    for t in range(tokens.shape[0]):
        x = jnp.maximum(emb_tbl[tokens[t]][None, :].astype(jnp.float32), 0.0)
        for l in range(L):
            xc = jnp.concatenate([x, h[l][None, :]], axis=1).astype(jnp.bfloat16)
            gates = (jnp.dot(xc, w_cat[l], preferred_element_type=jnp.float32)
                     + b_lstm[l][None, :])
            i_g = jax.nn.sigmoid(gates[:, 0 * H:1 * H])
            f_g = jax.nn.sigmoid(gates[:, 1 * H:2 * H])
            g_g = jnp.tanh(gates[:, 2 * H:3 * H])
            o_g = jax.nn.sigmoid(gates[:, 3 * H:4 * H])
            c_new = f_g * c[l][None, :] + i_g * g_g
            h_new = o_g * jnp.tanh(c_new)
            h = h.at[l].set(h_new[0])
            c = c.at[l].set(c_new[0])
            x = h_new
        logits = (jnp.dot(x.astype(jnp.bfloat16), w_out_t,
                          preferred_element_type=jnp.float32) + b_out)
        logps.append(jax.nn.log_softmax(logits, axis=1)[0])
    return jnp.stack(logps), (h.reshape(L, 1, H), c.reshape(L, 1, H))


def make_params(key, output_size, embedding_size, hidden_size, num_layers):
    assert embedding_size == hidden_size, "fused per-layer weights require E == H"
    V, E, H, L = output_size, embedding_size, hidden_size, num_layers
    ks = jax.random.split(key, 7)
    k_lstm = 1.0 / jnp.sqrt(H)
    emb = 0.2 * jax.random.normal(ks[0], (V, E), jnp.float32)
    # PyTorch LSTM stores weight_ih_l{k}: (4H, in), weight_hh_l{k}: (4H, H); pre-transpose & fuse.
    w_ih = jax.random.uniform(ks[1], (L, 4 * H, E), jnp.float32, -k_lstm, k_lstm)
    w_hh = jax.random.uniform(ks[2], (L, 4 * H, H), jnp.float32, -k_lstm, k_lstm)
    b_ih = jax.random.uniform(ks[3], (L, 4 * H), jnp.float32, -k_lstm, k_lstm)
    b_hh = jax.random.uniform(ks[4], (L, 4 * H), jnp.float32, -k_lstm, k_lstm)
    w_out = 0.2 * jax.random.normal(ks[5], (V, H), jnp.float32)
    b_out = jax.random.uniform(ks[6], (V,), jnp.float32, -k_lstm, k_lstm)
    w_cat = jnp.concatenate(
        [jnp.transpose(w_ih, (0, 2, 1)),      # (L, E, 4H)
         jnp.transpose(w_hh, (0, 2, 1))],     # (L, H, 4H)
        axis=1)                               # (L, E+H, 4H)
    return {
        "embedding": emb.astype(jnp.bfloat16),        # (V, E)
        "w_cat": w_cat.astype(jnp.bfloat16),          # (L, E+H, 4H)
        "b_lstm": (b_ih + b_hh).astype(jnp.float32),  # (L, 4H)
        "w_out_t": w_out.T.astype(jnp.bfloat16),      # (H, V)
        "b_out": b_out[None, :].astype(jnp.float32),  # (1, V)
    }


if __name__ == "__main__":
    # Small shapes consistent with the module (original uses E=H=512; 128 keeps the test
    # small while staying lane-aligned).  T teacher-forced tokens in one pallas_call.
    V, E, H, L, T = 256, 128, 128, 2, 6
    key = jax.random.PRNGKey(0)
    kp, kh, kc, kt = jax.random.split(key, 4)

    params = make_params(kp, V, E, H, L)
    tokens = jax.random.randint(kt, (T,), 0, V, dtype=jnp.int32)
    h0 = 0.1 * jax.random.normal(kh, (L, 1, H), jnp.float32)
    c0 = 0.1 * jax.random.normal(kc, (L, 1, H), jnp.float32)

    logp, (h_new, c_new) = decoder_rnn_forward(tokens, (h0, c0), params)
    jax.block_until_ready((logp, h_new, c_new))

    ref_logp, (ref_h, ref_c) = _reference_forward(tokens, (h0, c0), params)
    assert jnp.allclose(logp, ref_logp, rtol=2e-3, atol=2e-3), \
        float(jnp.max(jnp.abs(logp - ref_logp)))
    assert jnp.allclose(h_new, ref_h, rtol=2e-3, atol=2e-3)
    assert jnp.allclose(c_new, ref_c, rtol=2e-3, atol=2e-3)
    print("KERNEL_OK")
</pallas_src>

<mosaic_0001>
module attributes {stable_mosaic.version = 11 : i64} {
  func.func @_decoder_kernel(%arg0: i32, %arg1: memref<6xi32, #tpu.memory_space<smem>>, %arg2: memref<1x1x128xbf16, #tpu.memory_space<vmem>>, %arg3: memref<2x256x512xbf16, #tpu.memory_space<vmem>>, %arg4: memref<2x512xf32, #tpu.memory_space<vmem>>, %arg5: memref<2x128xf32, #tpu.memory_space<vmem>>, %arg6: memref<2x128xf32, #tpu.memory_space<vmem>>, %arg7: memref<128x256xbf16, #tpu.memory_space<vmem>>, %arg8: memref<1x256xf32, #tpu.memory_space<vmem>>, %arg9: memref<1x1x256xf32, #tpu.memory_space<vmem>>, %arg10: memref<2x128xf32, #tpu.memory_space<vmem>>, %arg11: memref<2x128xf32, #tpu.memory_space<vmem>>) attributes {dimension_semantics = [#tpu.dimension_semantics<arbitrary>], iteration_bounds = array<i64: 6>, scalar_prefetch = 1 : i64, scratch_operands = 0 : i64, tpu.core_type = #tpu.core_type<tc>, window_params = [{transform_indices = @transform_0, window_bounds = array<i64: 1, 1, 128>}, {pipeline_mode = #tpu.pipeline_mode<synchronous>, transform_indices = @transform_1, window_bounds = array<i64: 2, 256, 512>}, {pipeline_mode = #tpu.pipeline_mode<synchronous>, transform_indices = @transform_2, window_bounds = array<i64: 2, 512>}, {pipeline_mode = #tpu.pipeline_mode<synchronous>, transform_indices = @transform_3, window_bounds = array<i64: 2, 128>}, {pipeline_mode = #tpu.pipeline_mode<synchronous>, transform_indices = @transform_4, window_bounds = array<i64: 2, 128>}, {pipeline_mode = #tpu.pipeline_mode<synchronous>, transform_indices = @transform_5, window_bounds = array<i64: 128, 256>}, {pipeline_mode = #tpu.pipeline_mode<synchronous>, transform_indices = @transform_6, window_bounds = array<i64: 1, 256>}, {transform_indices = @transform_7, window_bounds = array<i64: 1, 1, 256>}, {pipeline_mode = #tpu.pipeline_mode<synchronous>, transform_indices = @transform_8, window_bounds = array<i64: 2, 128>}, {pipeline_mode = #tpu.pipeline_mode<synchronous>, transform_indices = @transform_9, window_bounds = array<i64: 2, 128>}]} {
    %c0_i32 = arith.constant 0 : i32
    %0 = arith.cmpi eq, %arg0, %c0_i32 : i32
    %1 = arith.extui %0 : i1 to i32
    %c0_i32_0 = arith.constant 0 : i32
    %2 = arith.cmpi ne, %1, %c0_i32_0 : i32
    scf.if %2 {
      %c0_46 = arith.constant 0 : index
      %c0_47 = arith.constant 0 : index
      %98 = vector.load %arg5[%c0_46, %c0_47] : memref<2x128xf32, #tpu.memory_space<vmem>>, vector<2x128xf32>
      %c0_48 = arith.constant 0 : index
      %c0_49 = arith.constant 0 : index
      %99 = vector.load %arg10[%c0_48, %c0_49] : memref<2x128xf32, #tpu.memory_space<vmem>>, vector<2x128xf32>
      tpu.vector_store %arg10[%c0_48, %c0_49], %98 {strides = array<i32>} : memref<2x128xf32, #tpu.memory_space<vmem>>, vector<2x128xf32>,
      %c0_50 = arith.constant 0 : index
      %c0_51 = arith.constant 0 : index
      %100 = vector.load %arg6[%c0_50, %c0_51] : memref<2x128xf32, #tpu.memory_space<vmem>>, vector<2x128xf32>
      %c0_52 = arith.constant 0 : index
      %c0_53 = arith.constant 0 : index
      %101 = vector.load %arg11[%c0_52, %c0_53] : memref<2x128xf32, #tpu.memory_space<vmem>>, vector<2x128xf32>
      tpu.vector_store %arg11[%c0_52, %c0_53], %100 {strides = array<i32>} : memref<2x128xf32, #tpu.memory_space<vmem>>, vector<2x128xf32>,
    } else {
    }
    %c0 = arith.constant 0 : index
    %c0_1 = arith.constant 0 : index
    %c0_2 = arith.constant 0 : index
    %3 = vector.load %arg2[%c0, %c0_1, %c0_2] : memref<1x1x128xbf16, #tpu.memory_space<vmem>>, vector<1x1x128xbf16>
    %4 = vector.shape_cast %3 : vector<1x1x128xbf16> to vector<1x128xbf16>
    %5 = arith.extf %4 : vector<1x128xbf16> to vector<1x128xf32>
    %cst = arith.constant 0.000000e+00 : f32
    %6 = vector.broadcast %cst : f32 to vector<1x128xf32>
    %7 = arith.maximumf %5, %6 : vector<1x128xf32>
    %c0_3 = arith.constant 0 : index
    %c0_4 = arith.constant 0 : index
    %8 = vector.load %arg10[%c0_3, %c0_4] : memref<2x128xf32, #tpu.memory_space<vmem>>, vector<1x128xf32>
    %c0_5 = arith.constant 0 : index
    %c0_6 = arith.constant 0 : index
    %9 = vector.load %arg11[%c0_5, %c0_6] : memref<2x128xf32, #tpu.memory_space<vmem>>, vector<1x128xf32>
    %10 = tpu.concatenate %7, %8 in 1 : vector<1x128xf32>, vector<1x128xf32> -> vector<1x256xf32>
    %11 = arith.truncf %10 : vector<1x256xf32> to vector<1x256xbf16>
    %c0_7 = arith.constant 0 : index
    %c0_8 = arith.constant 0 : index
    %c0_9 = arith.constant 0 : index
    %12 = vector.load %arg3[%c0_7, %c0_8, %c0_9] : memref<2x256x512xbf16, #tpu.memory_space<vmem>>, vector<1x256x512xbf16>
    %13 = vector.shape_cast %12 : vector<1x256x512xbf16> to vector<256x512xbf16>
    %cst_10 = arith.constant dense<0.000000e+00> : vector<1x512xf32>
    %14 = tpu.matmul %11, %13, %cst_10 {dimension_numbers = #tpu.dot_dimension_numbers<[1], [0], [0], [1], [0, 0, 1, 1], [], []>} : vector<1x256xbf16>, vector<256x512xbf16>, vector<1x512xf32> -> vector<1x512xf32>
    %c0_11 = arith.constant 0 : index
    %c0_12 = arith.constant 0 : index
    %15 = vector.load %arg4[%c0_11, %c0_12] : memref<2x512xf32, #tpu.memory_space<vmem>>, vector<1x512xf32>
    %16 = arith.addf %14, %15 : vector<1x512xf32>
    %17 = vector.extract_strided_slice %16 {offsets = [0, 0], sizes = [1, 128], strides = [1, 1]} : vector<1x512xf32> to vector<1x128xf32>
    %18 = arith.negf %17 : vector<1x128xf32>
    %19 = math.exp %18 : vector<1x128xf32>
    %cst_13 = arith.constant 1.000000e+00 : f32
    %20 = vector.broadcast %cst_13 : f32 to vector<1x128xf32>
    %21 = arith.addf %20, %19 : vector<1x128xf32>
    %22 = arith.divf %20, %21 : vector<1x128xf32>
    %23 = vector.extract_strided_slice %16 {offsets = [0, 128], sizes = [1, 128], strides = [1, 1]} : vector<1x512xf32> to vector<1x128xf32>
    %24 = arith.negf %23 : vector<1x128xf32>
    %25 = math.exp %24 : vector<1x128xf32>
    %cst_14 = arith.constant 1.000000e+00 : f32
    %26 = vector.broadcast %cst_14 : f32 to vector<1x128xf32>
    %27 = arith.addf %26, %25 : vector<1x128xf32>
    %28 = arith.divf %26, %27 : vector<1x128xf32>
    %29 = vector.extract_strided_slice %16 {offsets = [0, 256], sizes = [1, 128], strides = [1, 1]} : vector<1x512xf32> to vector<1x128xf32>
    %30 = math.tanh %29 : vector<1x128xf32>
    %31 = vector.extract_strided_slice %16 {offsets = [0, 384], sizes = [1, 128], strides = [1, 1]} : vector<1x512xf32> to vector<1x128xf32>
    %32 = arith.negf %31 : vector<1x128xf32>
    %33 = math.exp %32 : vector<1x128xf32>
    %cst_15 = arith.constant 1.000000e+00 : f32
    %34 = vector.broadcast %cst_15 : f32 to vector<1x128xf32>
    %35 = arith.addf %34, %33 : vector<1x128xf32>
    %36 = arith.divf %34, %35 : vector<1x128xf32>
    %37 = arith.mulf %28, %9 : vector<1x128xf32>
    %38 = arith.mulf %22, %30 : vector<1x128xf32>
    %39 = arith.addf %37, %38 : vector<1x128xf32>
    %40 = math.tanh %39 : vector<1x128xf32>
    %41 = arith.mulf %36, %40 : vector<1x128xf32>
    %c0_16 = arith.constant 0 : index
    %c0_17 = arith.constant 0 : index
    %42 = vector.load %arg10[%c0_16, %c0_17] : memref<2x128xf32, #tpu.memory_space<vmem>>, vector<1x128xf32>
    tpu.vector_store %arg10[%c0_16, %c0_17], %41 {strides = array<i32>} : memref<2x128xf32, #tpu.memory_space<vmem>>, vector<1x128xf32>,
    %c0_18 = arith.constant 0 : index
    %c0_19 = arith.constant 0 : index
    %43 = vector.load %arg11[%c0_18, %c0_19] : memref<2x128xf32, #tpu.memory_space<vmem>>, vector<1x128xf32>
    tpu.vector_store %arg11[%c0_18, %c0_19], %39 {strides = array<i32>} : memref<2x128xf32, #tpu.memory_space<vmem>>, vector<1x128xf32>,
    %c1 = arith.constant 1 : index
    %c0_20 = arith.constant 0 : index
    %44 = vector.load %arg10[%c1, %c0_20] : memref<2x128xf32, #tpu.memory_space<vmem>>, vector<1x128xf32>
    %c1_21 = arith.constant 1 : index
    %c0_22 = arith.constant 0 : index
    %45 = vector.load %arg11[%c1_21, %c0_22] : memref<2x128xf32, #tpu.memory_space<vmem>>, vector<1x128xf32>
    %46 = tpu.concatenate %41, %44 in 1 : vector<1x128xf32>, vector<1x128xf32> -> vector<1x256xf32>
    %47 = arith.truncf %46 : vector<1x256xf32> to vector<1x256xbf16>
    %c1_23 = arith.constant 1 : index
    %c0_24 = arith.constant 0 : index
    %c0_25 = arith.constant 0 : index
    %48 = vector.load %arg3[%c1_23, %c0_24, %c0_25] : memref<2x256x512xbf16, #tpu.memory_space<vmem>>, vector<1x256x512xbf16>
    %49 = vector.shape_cast %48 : vector<1x256x512xbf16> to vector<256x512xbf16>
    %cst_26 = arith.constant dense<0.000000e+00> : vector<1x512xf32>
    %50 = tpu.matmul %47, %49, %cst_26 {dimension_numbers = #tpu.dot_dimension_numbers<[1], [0], [0], [1], [0, 0, 1, 1], [], []>} : vector<1x256xbf16>, vector<256x512xbf16>, vector<1x512xf32> -> vector<1x512xf32>
    %c1_27 = arith.constant 1 : index
    %c0_28 = arith.constant 0 : index
    %51 = vector.load %arg4[%c1_27, %c0_28] : memref<2x512xf32, #tpu.memory_space<vmem>>, vector<1x512xf32>
    %52 = arith.addf %50, %51 : vector<1x512xf32>
    %53 = vector.extract_strided_slice %52 {offsets = [0, 0], sizes = [1, 128], strides = [1, 1]} : vector<1x512xf32> to vector<1x128xf32>
    %54 = arith.negf %53 : vector<1x128xf32>
    %55 = math.exp %54 : vector<1x128xf32>
    %cst_29 = arith.constant 1.000000e+00 : f32
    %56 = vector.broadcast %cst_29 : f32 to vector<1x128xf32>
    %57 = arith.addf %56, %55 : vector<1x128xf32>
    %58 = arith.divf %56, %57 : vector<1x128xf32>
    %59 = vector.extract_strided_slice %52 {offsets = [0, 128], sizes = [1, 128], strides = [1, 1]} : vector<1x512xf32> to vector<1x128xf32>
    %60 = arith.negf %59 : vector<1x128xf32>
    %61 = math.exp %60 : vector<1x128xf32>
    %cst_30 = arith.constant 1.000000e+00 : f32
    %62 = vector.broadcast %cst_30 : f32 to vector<1x128xf32>
    %63 = arith.addf %62, %61 : vector<1x128xf32>
    %64 = arith.divf %62, %63 : vector<1x128xf32>
    %65 = vector.extract_strided_slice %52 {offsets = [0, 256], sizes = [1, 128], strides = [1, 1]} : vector<1x512xf32> to vector<1x128xf32>
    %66 = math.tanh %65 : vector<1x128xf32>
    %67 = vector.extract_strided_slice %52 {offsets = [0, 384], sizes = [1, 128], strides = [1, 1]} : vector<1x512xf32> to vector<1x128xf32>
    %68 = arith.negf %67 : vector<1x128xf32>
    %69 = math.exp %68 : vector<1x128xf32>
    %cst_31 = arith.constant 1.000000e+00 : f32
    %70 = vector.broadcast %cst_31 : f32 to vector<1x128xf32>
    %71 = arith.addf %70, %69 : vector<1x128xf32>
    %72 = arith.divf %70, %71 : vector<1x128xf32>
    %73 = arith.mulf %64, %45 : vector<1x128xf32>
    %74 = arith.mulf %58, %66 : vector<1x128xf32>
    %75 = arith.addf %73, %74 : vector<1x128xf32>
    %76 = math.tanh %75 : vector<1x128xf32>
    %77 = arith.mulf %72, %76 : vector<1x128xf32>
    %c1_32 = arith.constant 1 : index
    %c0_33 = arith.constant 0 : index
    %78 = vector.load %arg10[%c1_32, %c0_33] : memref<2x128xf32, #tpu.memory_space<vmem>>, vector<1x128xf32>
    tpu.vector_store %arg10[%c1_32, %c0_33], %77 {strides = array<i32>} : memref<2x128xf32, #tpu.memory_space<vmem>>, vector<1x128xf32>,
    %c1_34 = arith.constant 1 : index
    %c0_35 = arith.constant 0 : index
    %79 = vector.load %arg11[%c1_34, %c0_35] : memref<2x128xf32, #tpu.memory_space<vmem>>, vector<1x128xf32>
    tpu.vector_store %arg11[%c1_34, %c0_35], %75 {strides = array<i32>} : memref<2x128xf32, #tpu.memory_space<vmem>>, vector<1x128xf32>,
    %80 = arith.truncf %77 : vector<1x128xf32> to vector<1x128xbf16>
    %c0_36 = arith.constant 0 : index
    %c0_37 = arith.constant 0 : index
    %81 = vector.load %arg7[%c0_36, %c0_37] : memref<128x256xbf16, #tpu.memory_space<vmem>>, vector<128x256xbf16>
    %cst_38 = arith.constant dense<0.000000e+00> : vector<1x256xf32>
    %82 = tpu.matmul %80, %81, %cst_38 {dimension_numbers = #tpu.dot_dimension_numbers<[1], [0], [0], [1], [0, 0, 1, 1], [], []>} : vector<1x128xbf16>, vector<128x256xbf16>, vector<1x256xf32> -> vector<1x256xf32>
    %c0_39 = arith.constant 0 : index
    %c0_40 = arith.constant 0 : index
    %83 = vector.load %arg8[%c0_39, %c0_40] : memref<1x256xf32, #tpu.memory_space<vmem>>, vector<1x256xf32>
    %84 = arith.addf %82, %83 : vector<1x256xf32>
    %cst_41 = arith.constant dense<0xFF800000> : vector<1xf32>
    %85 = vector.multi_reduction <maximumf>, %84, %cst_41 [1] : vector<1x256xf32> to vector<1xf32>
    %86 = vector.shape_cast %85 : vector<1xf32> to vector<1x1xf32>
    %87 = vector.broadcast %86 : vector<1x1xf32> to vector<1x256xf32>
    %88 = arith.subf %84, %87 : vector<1x256xf32>
    %89 = math.exp %88 : vector<1x256xf32>
    %cst_42 = arith.constant dense<0.000000e+00> : vector<1xf32>
    %90 = vector.multi_reduction <add>, %89, %cst_42 [1] : vector<1x256xf32> to vector<1xf32>
    %91 = vector.shape_cast %90 : vector<1xf32> to vector<1x1xf32>
    %92 = math.log %91 : vector<1x1xf32>
    %93 = vector.broadcast %92 : vector<1x1xf32> to vector<1x256xf32>
    %94 = arith.subf %88, %93 : vector<1x256xf32>
    %c0_43 = arith.constant 0 : index
    %c0_44 = arith.constant 0 : index
    %c0_45 = arith.constant 0 : index
    %95 = vector.load %arg9[%c0_43, %c0_44, %c0_45] : memref<1x1x256xf32, #tpu.memory_space<vmem>>, vector<1x1x256xf32>
    %96 = vector.shape_cast %95 : vector<1x1x256xf32> to vector<1x256xf32>
    %97 = vector.shape_cast %94 : vector<1x256xf32> to vector<1x1x256xf32>
    tpu.vector_store %arg9[%c0_43, %c0_44, %c0_45], %97 {strides = array<i32>} : memref<1x1x256xf32, #tpu.memory_space<vmem>>, vector<1x1x256xf32>,
    return
  }
  func.func @transform_0(%arg0: i32, %arg1: memref<6xi32, #tpu.memory_space<smem>>) -> (i32, i32, i32) {
    %0 = arith.index_cast %arg0 : i32 to index
    %1 = memref.load %arg1[%0] : memref<6xi32, #tpu.memory_space<smem>>
    %c0_i32 = arith.constant 0 : i32
    %c0_i32_0 = arith.constant 0 : i32
    %c0_i32_1 = arith.constant 0 : i32
    return %1, %c0_i32, %c0_i32_0 : i32, i32, i32
  }
  func.func @transform_1(%arg0: i32, %arg1: memref<6xi32, #tpu.memory_space<smem>>) -> (i32, i32, i32) {
    %c0_i32 = arith.constant 0 : i32
    %c0_i32_0 = arith.constant 0 : i32
    %c0_i32_1 = arith.constant 0 : i32
    %c0_i32_2 = arith.constant 0 : i32
    return %c0_i32, %c0_i32_0, %c0_i32_1 : i32, i32, i32
  }
  func.func @transform_2(%arg0: i32, %arg1: memref<6xi32, #tpu.memory_space<smem>>) -> (i32, i32) {
    %c0_i32 = arith.constant 0 : i32
    %c0_i32_0 = arith.constant 0 : i32
    %c0_i32_1 = arith.constant 0 : i32
    return %c0_i32, %c0_i32_0 : i32, i32
  }
  func.func @transform_3(%arg0: i32, %arg1: memref<6xi32, #tpu.memory_space<smem>>) -> (i32, i32) {
    %c0_i32 = arith.constant 0 : i32
    %c0_i32_0 = arith.constant 0 : i32
    %c0_i32_1 = arith.constant 0 : i32
    return %c0_i32, %c0_i32_0 : i32, i32
  }
  func.func @transform_4(%arg0: i32, %arg1: memref<6xi32, #tpu.memory_space<smem>>) -> (i32, i32) {
    %c0_i32 = arith.constant 0 : i32
    %c0_i32_0 = arith.constant 0 : i32
    %c0_i32_1 = arith.constant 0 : i32
    return %c0_i32, %c0_i32_0 : i32, i32
  }
  func.func @transform_5(%arg0: i32, %arg1: memref<6xi32, #tpu.memory_space<smem>>) -> (i32, i32) {
    %c0_i32 = arith.constant 0 : i32
    %c0_i32_0 = arith.constant 0 : i32
    %c0_i32_1 = arith.constant 0 : i32
    return %c0_i32, %c0_i32_0 : i32, i32
  }
  func.func @transform_6(%arg0: i32, %arg1: memref<6xi32, #tpu.memory_space<smem>>) -> (i32, i32) {
    %c0_i32 = arith.constant 0 : i32
    %c0_i32_0 = arith.constant 0 : i32
    %c0_i32_1 = arith.constant 0 : i32
    return %c0_i32, %c0_i32_0 : i32, i32
  }
  func.func @transform_7(%arg0: i32, %arg1: memref<6xi32, #tpu.memory_space<smem>>) -> (i32, i32, i32) {
    %c0_i32 = arith.constant 0 : i32
    %c0_i32_0 = arith.constant 0 : i32
    %c0_i32_1 = arith.constant 0 : i32
    return %arg0, %c0_i32, %c0_i32_0 : i32, i32, i32
  }
  func.func @transform_8(%arg0: i32, %arg1: memref<6xi32, #tpu.memory_space<smem>>) -> (i32, i32) {
    %c0_i32 = arith.constant 0 : i32
    %c0_i32_0 = arith.constant 0 : i32
    %c0_i32_1 = arith.constant 0 : i32
    return %c0_i32, %c0_i32_0 : i32, i32
  }
  func.func @transform_9(%arg0: i32, %arg1: memref<6xi32, #tpu.memory_space<smem>>) -> (i32, i32) {
    %c0_i32 = arith.constant 0 : i32
    %c0_i32_0 = arith.constant 0 : i32
    %c0_i32_1 = arith.constant 0 : i32
    return %c0_i32, %c0_i32_0 : i32, i32
  }
}

</mosaic_0001>

<bundles_post_ra>
// kernel: tpu_custom_call.1
= control target key start
LH: loop header
LB: loop body
LE: loop exit
PB: predicated region body
PF: predicated region fallthrough
CT: control target
= control target key end

     0   :  { %s2741_s0 = inlined_call_operand.vmem [shape: s32[6], index: 0, kind: input, shape index: {}]   ;;  %s2742_s1 = inlined_call_operand.vmem [shape: bf16[256,1,128], index: 1, kind: input, shape index: {}]   ;;  %s2743_s2 = inlined_call_operand.hbm [shape: bf16[2,256,512], index: 2, kind: input, shape index: {}]   ;;  %s2744_s3 = inlined_call_operand.vmem [shape: f32[2,512], index: 3, kind: input, shape index: {}]   ;;  %s2745_s4 = inlined_call_operand.vmem [shape: f32[2,128], index: 4, kind: input, shape index: {}]   ;;  %s2746_s5 = inlined_call_operand.vmem [shape: f32[2,128], index: 5, kind: input, shape index: {}]   ;;  %s2747_s6 = inlined_call_operand.vmem [shape: bf16[128,256], index: 6, kind: input, shape index: {}]   ;;  %s2748_s7 = inlined_call_operand.vmem [shape: f32[1,256], index: 7, kind: input, shape index: {}]   ;;  %s2749_s8 = inlined_call_operand.hbm [shape: f32[6,1,256], index: 8, kind: output, shape index: {0}]   ;;  %s2750_s9 = inlined_call_operand.hbm [shape: f32[2,128], index: 9, kind: output, shape index: {1}]   ;;  %s2751_s10 = inlined_call_operand.hbm [shape: f32[2,128], index: 10, kind: output, shape index: {2}]  }
   0x1   :  { %s16_s15 = sshll.u32 %s2741_s0, 4  ;;  %s17_s15 = int_to_ptr.vmem [resolvable:$true] %s16_s15 }
   0x2   :  { %s2212_s16 = scalar_lea.vmem %s17_s15, 16  ;;  %p2217_p1 = scmp.lt.s32.totalorder %s17_s15, %s17_s15 }
   0x3   :  { %p2213_p0 = scmp.ne.s32.totalorder %s17_s15, %s2212_s16  ;;  %p2218_p2 = scmp.lt.s32.totalorder %s2212_s16, %s2212_s16 }
   0x5   :  { %p2219_p3 = por %p2218_p2, %p2217_p1 }
   0x7   :  { %p2220_p4 = pnand %p2219_p3, %p2213_p0 }
   0x9   :  { %2223 = shalt.err (!%p2220_p4)  }
   0xa   :  { %s2378_s17 = smov [#allocation3]  }
   0xb   :  { %19 = dma.vmem_to_smem %s17_s15, 16, %s2378_s17, [#allocation2] }
   0xc   :  { %2348 = dma.done.wait [#allocation2], 16 }
   0xd   :  { %2349 = vsyncadd [#allocation2], 4294967280 }
   0xe   :  { %21 = sfence }
   0xf   :  { %22 = vsyncpa [#allocation5], 0 }
  0x10   :  { %23 = vsyncpa [#allocation6], 0 }
  0x11   :  { %25 = vsyncpa [#allocation6 + $0x1], 0 }
  0x12   :  { %26 = vsyncpa [#allocation9], 0  ;;  %s2445_s18 = smov 0   ;;  %s2447_s0 = smov 0  }
  0x13   :  { %s2449_s19 = smov 0   ;;  %s2451_s20 = smov 0  }
  0x14 LB: > { %s2466_s21 = sadd.s32 4294967295, %s2376_s20   ;;  %s1720_s22 = sadd.s32 4294967294, %s2376_s20   ;;  %s2376_s20 = sphi %s2451_s20, %s2779_s20   ;;  %s2372_s19 = sphi %s2449_s19, %s2778_s19   ;;  %s2368_s0 = sphi %s2447_s0, %s2777_s0   ;;  %s2364_s18 = sphi %s2445_s18, %s2776_s18  }
  0x15   : > { %s2470_s23 = sadd.s32 1, %s2376_s20   ;;  %s193_s24 = sadd.s32 1, %s2372_s19 }
  0x16   : > { %s190_s25 = ssub.s32 %s2376_s20, %s2470_s23  ;;  %p203_p5 = scmp.ne.s32.totalorder %s2372_s19, %s2368_s0 }
  0x17   : > { %p191_p6 = scmp.eq.s32.totalorder %s190_s25, 0  ;;  %p2752_p7 = scmp.eq.s32.totalorder %s2466_s21, 5 }
  0x18   : > { %p209_p8 = scmp.ne.s32.totalorder %s2368_s0, %s2364_s18  ;;  %p210_p9 = scmp.eq.s32.totalorder %s1720_s22, 5 }
  0x19   : > { %s2481_s26 = scalar_select %p191_p6, %s2372_s19, %s193_s24  }
  0x1a   : > { %p2485_p10 = por %p2752_p7, %p203_p5  ;;  %p2489_p11 = por %p210_p9, %p209_p8 }
  0x1b   : > { %p1721_p12 = scmp.ge.s32.totalorder %s2376_s20, 1  ;;  %p259_p13 = scmp.lt.s32.totalorder %s2376_s20, 7 }
  0x1c   : > { %s2757_s27 = scalar_select %p2485_p10, 1, 0 }
  0x1d   : > { %s2758_s28 = scalar_select %p2489_p11, 1, 0 }
  0x1e   : > { %p2753_p1 = scmp.eq.s32.totalorder %s2466_s21, 0  ;;  %p2497_p2 = pnand %p1721_p12, %p259_p13 }
  0x1f   : > { %s2379_s30 = smov [#allocation4]   ;;  %s2224_s15 = scalar_lea.hbm %s2743_s2, 16384 }
  0x20   : > { %s2759_s29 = scalar_select %p2497_p2, 1, 0 }
  0x21   : > { %s271_s11 = sshll.u32 %s2379_s30, 4  ;;  %p1903_p3 = pneg %p2497_p2  ;;  %s272_s11 = int_to_ptr.vmem [resolvable:$true] %s271_s11 }
  0x22   : > { %p2225_p5 = scmp.ne.s32.totalorder %s2743_s2, %s2224_s15  ;;  %p2231_p12 = scmp.lt.u32.totalorder %s2224_s15, %s2743_s2 }
  0x23   : > { %p2505_p4 = pnand %p2753_p1, %p1903_p3 }
  0x25   : > { %p2226_p6 = pneg %p2505_p4 }
  0x27   : > { %p2227_p8 = pnand %p2226_p6, %p2225_p5 }
  0x29   : > { %p2228_p9 = pneg %p2227_p8 }
  0x2b   : > { %p2233_p13 = pnand %p2231_p12, %p2228_p9 }
  0x2d   : > { %2236 = shalt.err (!%p2233_p13)
}
  0x2e   : > { %s2237_s25 = scalar_lea.vmem %s272_s11, 16384  ;;  %p2245_p1 = scmp.lt.s32.totalorder %s272_s11, %s272_s11 }
  0x2f   : > { %p2238_p3 = scmp.ne.s32.totalorder %s272_s11, %s2237_s25  ;;  %p2246_p11 = scmp.lt.s32.totalorder %s2237_s25, %s2237_s25 }
  0x31   : > { %p2240_p7 = pnand %p2238_p3, %p2226_p6  ;;  %p2247_p10 = por %p2246_p11, %p2245_p1 }
  0x33   : > { %p2241_p0 = pneg %p2240_p7 }
  0x35   : > { %p2248_p2 = pnand %p2247_p10, %p2241_p0 }
  0x37   : > { %2251 = shalt.err (!%p2248_p2)
}
  0x38   : > { %s2380_s30 = smov 256   ;;  %s2381_s13 = smov 16  }
  0x39   : > { %1906 = dma.hbm_to_vmem [thread:$0]  (!%p2505_p4), %s2743_s2, 16384, %s272_s11, [#allocation5], %s2380_s30, %s2380_s30, %s2381_s13  }
  0x3a   : > { %p2761_p5 = scmp.ne.s32.totalorder %s2759_s29, 0 }
  0x3b   : > { %p2762_p8 = scmp.eq.s32.totalorder (!%p2761_p5), %s2466_s21, 0 }
  0x3c   : > { %310 = sbr.rel (%p2761_p5) target bundleno = 1224 (0x4c8), region = 48 }
  0x43   : > { %2351 = dma.done.wait (%p2762_p8), [#allocation5], 16384   ;;  %p2763_p7 = pmov %p2762_p8 }
  0x44   : > { %s2756_s15 = sand.u32 1, %s2368_s0   ;;  %s345_s17 = sld [smem:[#allocation3 + %s2466_s21]] }
  0x45   : > { %2353 = vsyncadd (%p2763_p7), [#allocation5], 4294950912  ;;  %s2535_s12 = sshll.u32 %s2756_s15, 1  ;;  %p2764_p11 = scmp.ne.s32.totalorder %s2466_s21, 0 }
  0x46   : > { %s340_s24 = scalar_lea.vmem [#allocation7], %s2535_s12  ;;  %v355_v0 = vld [vmem:[%s2745_s4] sm:$0x3] (!%p2764_p11) }
  0x47   : > { %354 = sbr.rel (%p2764_p11) target bundleno = 78 (0x4e), region = 56  ;;  %v357_v1 = vld [vmem:[%s2746_s5] sm:$0x3] (!%p2764_p11)  ;;  %356 = vst [vmem:[#allocation8] sm:$0x3] (!%p2764_p11), %v355_v0 }
  0x48   : > { %358 = vst [vmem:[#allocation10] sm:$0x3] (!%p2764_p11), %v357_v1 }
  0x4a   : > { %p346_p10 = scmp.lt.s32.totalorder %s345_s17, 255 }
  0x4c   : > { %s2781_s17 = smov (!%p346_p10, %s345_s17), 255 }
  0x4d   : > { %s348_s22 = scalar_lea.vmem %s2742_s1, %s2781_s17 }
  0x4e PF: > { %v1958_v2 = vld [vmem:[#allocation4 + $0x4] ss:$16 sps:$4 sm:$0xff]   ;;  %v1960_v3 = vld [vmem:[#allocation4] ss:$16 sps:$4 sm:$0xff]   ;;  %v1969_v7 = vld [vmem:[#allocation4 + $0xc] ss:$16 sps:$4 sm:$0xff]  }
  0x4f   : > { %772 = vmatprep.subr.bf16.mxu0 %v1958_v2  ;;  %v1961_v4 = vld [vmem:[#allocation4 + $0x24] ss:$16 sps:$4 sm:$0xff]   ;;  %v1963_v5 = vld [vmem:[#allocation4 + $0x20] ss:$16 sps:$4 sm:$0xff]   ;;  %v1972_v8 = vld [vmem:[#allocation4 + $0x8] ss:$16 sps:$4 sm:$0xff]   ;;  %813 = vmatprep.subr.bf16.mxu1 %v1969_v7 }
  0x50   : > { %773 = vmatpush1.bf16.msra.mxu0 %v1960_v3  ;;  %v1964_v6 = vld [vmem:[#allocation4 + $0x44] ss:$16 sps:$4 sm:$0xff]   ;;  %v1966_v9 = vld [vmem:[#allocation4 + $0x40] ss:$16 sps:$4 sm:$0xff]   ;;  %814 = vmatpush1.bf16.msra.mxu1 %v1972_v8  ;;  %v1975_v11 = vld [vmem:[#allocation4 + $0x2c] ss:$16 sps:$4 sm:$0xff]  }
  0x51   : > { %774 = vmatprep.subr.bf16.mxu0 %v1961_v4  ;;  %v1967_v10 = vld [vmem:[#allocation4 + $0x64] ss:$16 sps:$4 sm:$0xff]   ;;  %v1978_v12 = vld [vmem:[#allocation4 + $0x28] ss:$16 sps:$4 sm:$0xff]   ;;  %815 = vmatprep.subr.bf16.mxu1 %v1975_v11  ;;  %v1971_v13 = vld [vmem:[#allocation4 + $0x60] ss:$16 sps:$4 sm:$0xff]  }
  0x52   : > { %v1973_v14 = vld [vmem:[#allocation4 + $0x84] ss:$16 sps:$4 sm:$0xff]   ;;  %v1981_v15 = vld [vmem:[#allocation4 + $0x4c] ss:$16 sps:$4 sm:$0xff]   ;;  %v1984_v16 = vld [vmem:[#allocation4 + $0x48] ss:$16 sps:$4 sm:$0xff]  }
  0x53   : > { %v1987_v17 = vld [vmem:[#allocation4 + $0x6c] ss:$16 sps:$4 sm:$0xff]   ;;  %v1977_v18 = vld [vmem:[#allocation4 + $0x80] ss:$16 sps:$4 sm:$0xff]   ;;  %v1979_v19 = vld [vmem:[#allocation4 + $0xa4] ss:$16 sps:$4 sm:$0xff]  }
  0x54   : > { %775 = vmatpush1.bf16.msra.mxu0 %v1963_v5  ;;  %816 = vmatpush1.bf16.msra.mxu1 %v1978_v12  ;;  %v1990_v20 = vld [vmem:[#allocation4 + $0x68] ss:$16 sps:$4 sm:$0xff]   ;;  %v1993_v21 = vld [vmem:[#allocation4 + $0x8c] ss:$16 sps:$4 sm:$0xff]   ;;  %v1983_v22 = vld [vmem:[#allocation4 + $0xa0] ss:$16 sps:$4 sm:$0xff]  }
  0x55   : > { %776 = vmatprep.subr.bf16.mxu0 %v1964_v6  ;;  %817 = vmatprep.subr.bf16.mxu1 %v1981_v15  ;;  %v1985_v23 = vld [vmem:[#allocation4 + $0xc4] ss:$16 sps:$4 sm:$0xff]   ;;  %v1996_v24 = vld [vmem:[#allocation4 + $0x88] ss:$16 sps:$4 sm:$0xff]   ;;  %v1999_v25 = vld [vmem:[#allocation4 + $0xac] ss:$16 sps:$4 sm:$0xff]  }
  0x56   : > { %v1989_v26 = vld [vmem:[#allocation4 + $0xc0] ss:$16 sps:$4 sm:$0xff]   ;;  %v1991_v27 = vld [vmem:[#allocation4 + $0xe4] ss:$16 sps:$4 sm:$0xff]   ;;  %v2002_v28 = vld [vmem:[#allocation4 + $0xa8] ss:$16 sps:$4 sm:$0xff]  }
  0x57   : > { %v2005_v29 = vld [vmem:[#allocation4 + $0xcc] ss:$16 sps:$4 sm:$0xff]   ;;  %v1995_v30 = vld [vmem:[#allocation4 + $0xe0] ss:$16 sps:$4 sm:$0xff]   ;;  %v1997_v31 = vld [vmem:[#allocation4 + $0x104] ss:$16 sps:$4 sm:$0xff]  }
  0x58   : > { %777 = vmatpush1.bf16.msra.mxu0 %v1966_v9  ;;  %818 = vmatpush1.bf16.msra.mxu1 %v1984_v16  ;;  %v2008_v32 = vld [vmem:[#allocation4 + $0xc8] ss:$16 sps:$4 sm:$0xff]   ;;  %v2011_v33 = vld [vmem:[#allocation4 + $0xec] ss:$16 sps:$4 sm:$0xff]   ;;  %v2001_v34 = vld [vmem:[#allocation4 + $0x100] ss:$16 sps:$4 sm:$0xff]  }
  0x59   : > { %778 = vmatprep.subr.bf16.mxu0 %v1967_v10  ;;  %819 = vmatprep.subr.bf16.mxu1 %v1987_v17  ;;  %v2003_v35 = vld [vmem:[#allocation4 + $0x124] ss:$16 sps:$4 sm:$0xff]   ;;  %v2014_v36 = vld [vmem:[#allocation4 + $0xe8] ss:$16 sps:$4 sm:$0xff]   ;;  %v2017_v37 = vld [vmem:[#allocation4 + $0x10c] ss:$16 sps:$4 sm:$0xff]  }
  0x5a   : > { %v2007_v38 = vld [vmem:[#allocation4 + $0x120] ss:$16 sps:$4 sm:$0xff]   ;;  %v2009_v39 = vld [vmem:[#allocation4 + $0x144] ss:$16 sps:$4 sm:$0xff]   ;;  %v2020_v40 = vld [vmem:[#allocation4 + $0x108] ss:$16 sps:$4 sm:$0xff]  }
  0x5b   : > { %v2023_v41 = vld [vmem:[#allocation4 + $0x12c] ss:$16 sps:$4 sm:$0xff]   ;;  %v362_v42 = vld [vmem:[#allocation8] sm:$0x1]  ;;  %v2013_v43 = vld [vmem:[#allocation4 + $0x140] ss:$16 sps:$4 sm:$0xff]  }
  0x5c   : > { %779 = vmatpush1.bf16.msra.mxu0 %v1971_v13  ;;  %820 = vmatpush1.bf16.msra.mxu1 %v1990_v20  ;;  %v365_v44 = vpack.c.bf16 %v362_v42, %v362_v42  ;;  %v2015_v45 = vld [vmem:[#allocation4 + $0x164] ss:$16 sps:$4 sm:$0xff]   ;;  %v2026_v46 = vld [vmem:[#allocation4 + $0x128] ss:$16 sps:$4 sm:$0xff]   ;;  %v2029_v47 = vld [vmem:[#allocation4 + $0x14c] ss:$16 sps:$4 sm:$0xff]  }
  0x5d   : > { %780 = vmatprep.subr.bf16.mxu0 %v1973_v14  ;;  %821 = vmatprep.subr.bf16.mxu1 %v1993_v21  ;;  %v2019_v48 = vld [vmem:[#allocation4 + $0x160] ss:$16 sps:$4 sm:$0xff]   ;;  %v2021_v49 = vld [vmem:[#allocation4 + $0x184] ss:$16 sps:$4 sm:$0xff]   ;;  %v2032_v50 = vld [vmem:[#allocation4 + $0x148] ss:$16 sps:$4 sm:$0xff]  }
  0x5e   : > { %804 = vmatprep.mubr.bf16.mxu0 %v365_v44  ;;  %845 = vmatprep.mubr.bf16.mxu1 %v365_v44  ;;  %v2035_v51 = vld [vmem:[#allocation4 + $0x16c] ss:$16 sps:$4 sm:$0xff]   ;;  %v2025_v52 = vld [vmem:[#allocation4 + $0x180] ss:$16 sps:$4 sm:$0xff]   ;;  %v2027_v53 = vld [vmem:[#allocation4 + $0x1a4] ss:$16 sps:$4 sm:$0xff]  }
  0x5f   : > { %v2038_v54 = vld [vmem:[#allocation4 + $0x168] ss:$16 sps:$4 sm:$0xff]   ;;  %v2041_v55 = vld [vmem:[#allocation4 + $0x18c] ss:$16 sps:$4 sm:$0xff]   ;;  %v2031_v56 = vld [vmem:[#allocation4 + $0x1a0] ss:$16 sps:$4 sm:$0xff]  }
  0x60   : > { %781 = vmatpush1.bf16.msra.mxu0 %v1977_v18  ;;  %822 = vmatpush1.bf16.msra.mxu1 %v1996_v24  ;;  %v359_v57 = vld [vmem:[%s348_s22] sm:$0x1]  ;;  %v2033_v58 = vld [vmem:[#allocation4 + $0x1c4] ss:$16 sps:$4 sm:$0xff]   ;;  %v2044_v59 = vld [vmem:[#allocation4 + $0x188] ss:$16 sps:$4 sm:$0xff]  }
  0x61   : > { %782 = vmatprep.subr.bf16.mxu0 %v1979_v19  ;;  %823 = vmatprep.subr.bf16.mxu1 %v1999_v25  ;;  %v2037_v60 = vld [vmem:[#allocation4 + $0x1c0] ss:$16 sps:$4 sm:$0xff]   ;;  %v2045_v61 = vld [vmem:[#allocation4 + $0x1ac] ss:$16 sps:$4 sm:$0xff]   ;;  %v2039_v62 = vld [vmem:[#allocation4 + $0x1e4] ss:$16 sps:$4 sm:$0xff]   ;;  %v360_v63 = vunpack.c.l.bf16 %v359_v57 }
  0x62   : > { %v2047_v0 = vld [vmem:[#allocation4 + $0x1a8] ss:$16 sps:$4 sm:$0xff]   ;;  %v2048_v1 = vld [vmem:[#allocation4 + $0x1cc] ss:$16 sps:$4 sm:$0xff]   ;;  %v2043_v2 = vld [vmem:[#allocation4 + $0x1e0] ss:$16 sps:$4 sm:$0xff]  }
  0x63   : > { %v361_v3 = vmax.f32 %v360_v63, 0.0  ;;  %v2050_v4 = vld [vmem:[#allocation4 + $0x1c8] ss:$16 sps:$4 sm:$0xff]   ;;  %v2056_v5 = vld [vmem:[#allocation4 + $0x204] ss:$16 sps:$4 sm:$0xff]   ;;  %vm1550_vm0 = vcmask 1040384  }
  0x64   : > { %783 = vmatpush1.bf16.msra.mxu0 %v1983_v22  ;;  %824 = vmatpush1.bf16.msra.mxu1 %v2002_v28  ;;  %v2051_v6 = vld [vmem:[#allocation4 + $0x1ec] ss:$16 sps:$4 sm:$0xff]   ;;  %v2054_v7 = vld [vmem:[#allocation4 + $0x200] ss:$16 sps:$4 sm:$0xff]   ;;  %v2053_v9 = vld [vmem:[#allocation4 + $0x1e8] ss:$16 sps:$4 sm:$0xff]  }
  0x65   : > { %784 = vmatprep.subr.bf16.mxu0 %v1985_v23  ;;  %825 = vmatprep.subr.bf16.mxu1 %v2005_v29  ;;  %v364_v8 = vpack.c.bf16 %v361_v3, %v361_v3  ;;  %v2062_v10 = vld [vmem:[#allocation4 + $0x224] ss:$16 sps:$4 sm:$0xff]   ;;  %v2059_v11 = vld [vmem:[#allocation4 + $0x20c] ss:$16 sps:$4 sm:$0xff]   ;;  %v2060_v12 = vld [vmem:[#allocation4 + $0x220] ss:$16 sps:$4 sm:$0xff]  }
  0x66   : > { %v2057_v13 = vld [vmem:[#allocation4 + $0x208] ss:$16 sps:$4 sm:$0xff]   ;;  %v2068_v14 = vld [vmem:[#allocation4 + $0x244] ss:$16 sps:$4 sm:$0xff]   ;;  %v2065_v15 = vld [vmem:[#allocation4 + $0x22c] ss:$16 sps:$4 sm:$0xff]  }
  0x67   : > { %v2066_v16 = vld [vmem:[#allocation4 + $0x240] ss:$16 sps:$4 sm:$0xff]   ;;  %v2063_v17 = vld [vmem:[#allocation4 + $0x228] ss:$16 sps:$4 sm:$0xff]   ;;  %v2074_v18 = vld [vmem:[#allocation4 + $0x264] ss:$16 sps:$4 sm:$0xff]  }
  0x68   : > { %785 = vmatpush1.bf16.msra.mxu0 %v1989_v26  ;;  %826 = vmatpush1.bf16.msra.mxu1 %v2008_v32  ;;  %v2071_v19 = vld [vmem:[#allocation4 + $0x24c] ss:$16 sps:$4 sm:$0xff]   ;;  %v2072_v20 = vld [vmem:[#allocation4 + $0x260] ss:$16 sps:$4 sm:$0xff]   ;;  %v2069_v21 = vld [vmem:[#allocation4 + $0x248] ss:$16 sps:$4 sm:$0xff]  }
  0x69   : > { %786 = vmatprep.subr.bf16.mxu0 %v1991_v27  ;;  %827 = vmatprep.subr.bf16.mxu1 %v2011_v33  ;;  %v2077_v22 = vld [vmem:[#allocation4 + $0x26c] ss:$16 sps:$4 sm:$0xff]   ;;  %v2075_v23 = vld [vmem:[#allocation4 + $0x268] ss:$16 sps:$4 sm:$0xff]   ;;  %v2080_v24 = vld [vmem:[#allocation4 + $0x284] ss:$16 sps:$4 sm:$0xff]  }
  0x6a   : > { %v2083_v25 = vld [vmem:[#allocation4 + $0x28c] ss:$16 sps:$4 sm:$0xff]   ;;  %v2078_v26 = vld [vmem:[#allocation4 + $0x280] ss:$16 sps:$4 sm:$0xff]   ;;  %v2081_v27 = vld [vmem:[#allocation4 + $0x288] ss:$16 sps:$4 sm:$0xff]  }
  0x6b   : > { %v2086_v28 = vld [vmem:[#allocation4 + $0x2a4] ss:$16 sps:$4 sm:$0xff]   ;;  %v2089_v29 = vld [vmem:[#allocation4 + $0x2ac] ss:$16 sps:$4 sm:$0xff]   ;;  %v2102_v42 = vld [vmem:[#allocation4 + $0x300] ss:$16 sps:$4 sm:$0xff]  }
  0x6c   : > { %787 = vmatpush1.bf16.msra.mxu0 %v1995_v30  ;;  %828 = vmatpush1.bf16.msra.mxu1 %v2014_v36  ;;  %v2084_v30 = vld [vmem:[#allocation4 + $0x2a0] ss:$16 sps:$4 sm:$0xff]   ;;  %v2092_v32 = vld [vmem:[#allocation4 + $0x2c4] ss:$16 sps:$4 sm:$0xff]   ;;  %v2095_v33 = vld [vmem:[#allocation4 + $0x2cc] ss:$16 sps:$4 sm:$0xff]  }
  0x6d   : > { %788 = vmatprep.subr.bf16.mxu0 %v1997_v31  ;;  %829 = vmatprep.subr.bf16.mxu1 %v2017_v37  ;;  %v2087_v31 = vld [vmem:[#allocation4 + $0x2a8] ss:$16 sps:$4 sm:$0xff]   ;;  %v2098_v36 = vld [vmem:[#allocation4 + $0x2e4] ss:$16 sps:$4 sm:$0xff]   ;;  %v2101_v37 = vld [vmem:[#allocation4 + $0x2ec] ss:$16 sps:$4 sm:$0xff]  }
  0x6e   : > { %v2110_v44 = vld [vmem:[#allocation4 + $0x324] ss:$16 sps:$4 sm:$0xff]   ;;  %v2131_v57 = vld [vmem:[#allocation4 + $0x38c] ss:$16 sps:$4 sm:$0xff]   ;;  %v2141_v3 = vld [vmem:[#allocation4 + $0x3c8] ss:$16 sps:$4 sm:$0xff]  }
  0x6f   : > { %v2137_v63 = vld [vmem:[#allocation4 + $0x3ac] ss:$16 sps:$4 sm:$0xff]   ;;  %s2383_s29 = smov [#allocation8]   ;;  %p2765_p1 = scmp.eq.s32.totalorder %s2466_s21, 5 }
  0x70   : > { %789 = vmatpush1.bf16.msra.mxu0 %v2001_v34  ;;  %830 = vmatpush1.bf16.msra.mxu1 %v2020_v40  ;;  %v2090_v34 = vld [vmem:[#allocation4 + $0x2c0] ss:$16 sps:$4 sm:$0xff]   ;;  %v2104_v40 = vld [vmem:[#allocation4 + $0x304] ss:$16 sps:$4 sm:$0xff]   ;;  %s1620_s17 = sshll.u32 %s2383_s29, 4  ;;  %s1621_s17 = int_to_ptr.vmem [resolvable:$true] %s1620_s17 }
  0x71   : > { %790 = vmatprep.subr.bf16.mxu0 %v2003_v35  ;;  %831 = vmatprep.subr.bf16.mxu1 %v2023_v41  ;;  %v2093_v35 = vld [vmem:[#allocation4 + $0x2c8] ss:$16 sps:$4 sm:$0xff]   ;;  %v2107_v41 = vld [vmem:[#allocation4 + $0x30c] ss:$16 sps:$4 sm:$0xff]   ;;  %s2252_s15 = scalar_lea.vmem %s1621_s17, 32  ;;  %p2259_p6 = scmp.lt.s32.totalorder %s1621_s17, %s1621_s17 }
  0x72   : > { %p2253_p0 = scmp.ne.s32.totalorder %s1621_s17, %s2252_s15  ;;  %p2260_p9 = scmp.lt.s32.totalorder %s2252_s15, %s2252_s15 }
  0x74   : > { %791 = vmatpush1.bf16.msra.mxu0 %v2007_v38  ;;  %832 = vmatpush1.bf16.msra.mxu1 %v2026_v46  ;;  %v2096_v38 = vld [vmem:[#allocation4 + $0x2e0] ss:$16 sps:$4 sm:$0xff]   ;;  %p2254_p2 = pnand %p2253_p0, %p2765_p1  ;;  %p2261_p12 = por %p2260_p9, %p2259_p6 }
  0x75   : > { %792 = vmatprep.subr.bf16.mxu0 %v2009_v39  ;;  %833 = vmatprep.subr.bf16.mxu1 %v2029_v47  ;;  %v2099_v39 = vld [vmem:[#allocation4 + $0x2e8] ss:$16 sps:$4 sm:$0xff]   ;;  %v2108_v46 = vld [vmem:[#allocation4 + $0x320] ss:$16 sps:$4 sm:$0xff]  }
  0x76   : > { %v2111_v47 = vld [vmem:[#allocation4 + $0x328] ss:$16 sps:$4 sm:$0xff]   ;;  %p2255_p4 = pneg %p2254_p2 }
  0x78   : > { %793 = vmatpush1.bf16.msra.mxu0 %v2013_v43  ;;  %834 = vmatpush1.bf16.msra.mxu1 %v2032_v50  ;;  %v2105_v43 = vld [vmem:[#allocation4 + $0x308] ss:$16 sps:$4 sm:$0xff]   ;;  %v2114_v50 = vld [vmem:[#allocation4 + $0x340] ss:$16 sps:$4 sm:$0xff]   ;;  %p2262_p13 = pnand %p2261_p12, %p2255_p4 }
  0x79   : > { %794 = vmatprep.subr.bf16.mxu0 %v2015_v45  ;;  %835 = vmatprep.subr.bf16.mxu1 %v2035_v51  ;;  %v2113_v45 = vld [vmem:[#allocation4 + $0x32c] ss:$16 sps:$4 sm:$0xff]   ;;  %v2117_v51 = vld [vmem:[#allocation4 + $0x348] ss:$16 sps:$4 sm:$0xff]  }
  0x7c   : > { %795 = vmatpush1.bf16.msra.mxu0 %v2019_v48  ;;  %836 = vmatpush1.bf16.msra.mxu1 %v2038_v54  ;;  %v2116_v48 = vld [vmem:[#allocation4 + $0x344] ss:$16 sps:$4 sm:$0xff]   ;;  %v2120_v54 = vld [vmem:[#allocation4 + $0x360] ss:$16 sps:$4 sm:$0xff]  }
  0x7d   : > { %796 = vmatprep.subr.bf16.mxu0 %v2021_v49  ;;  %837 = vmatprep.subr.bf16.mxu1 %v2041_v55  ;;  %v2119_v49 = vld [vmem:[#allocation4 + $0x34c] ss:$16 sps:$4 sm:$0xff]   ;;  %v2123_v55 = vld [vmem:[#allocation4 + $0x368] ss:$16 sps:$4 sm:$0xff]  }
  0x80   : > { %797 = vmatpush1.bf16.msra.mxu0 %v2025_v52  ;;  %838 = vmatpush1.bf16.msra.mxu1 %v2044_v59  ;;  %v2122_v52 = vld [vmem:[#allocation4 + $0x364] ss:$16 sps:$4 sm:$0xff]   ;;  %v2129_v59 = vld [vmem:[#allocation4 + $0x388] ss:$16 sps:$4 sm:$0xff]  }
  0x81   : > { %798 = vmatprep.subr.bf16.mxu0 %v2027_v53  ;;  %839 = vmatprep.subr.bf16.mxu1 %v2045_v61  ;;  %v2125_v53 = vld [vmem:[#allocation4 + $0x36c] ss:$16 sps:$4 sm:$0xff]   ;;  %v2134_v61 = vld [vmem:[#allocation4 + $0x3a4] ss:$16 sps:$4 sm:$0xff]  }
  0x84   : > { %799 = vmatpush1.bf16.msra.mxu0 %v2031_v56  ;;  %840 = vmatpush1.bf16.msra.mxu1 %v2047_v0  ;;  %v2128_v56 = vld [vmem:[#allocation4 + $0x384] ss:$16 sps:$4 sm:$0xff]  }
  0x85   : > { %800 = vmatprep.subr.bf16.mxu0 %v2033_v58  ;;  %841 = vmatprep.subr.bf16.mxu1 %v2048_v1  ;;  %v2126_v58 = vld [vmem:[#allocation4 + $0x380] ss:$16 sps:$4 sm:$0xff]   ;;  %v2140_v0 = vld [vmem:[#allocation4 + $0x3c4] ss:$16 sps:$4 sm:$0xff]   ;;  %v2143_v1 = vld [vmem:[#allocation4 + $0x3cc] ss:$16 sps:$4 sm:$0xff]  }
  0x88   : > { %801 = vmatpush1.bf16.msra.mxu0 %v2037_v60  ;;  %842 = vmatpush1.bf16.msra.mxu1 %v2050_v4  ;;  %v2132_v60 = vld [vmem:[#allocation4 + $0x3a0] ss:$16 sps:$4 sm:$0xff]   ;;  %v880_v4 = vld [vmem:[#allocation8 + $0x1] sm:$0x1] }
  0x89   : > { %802 = vmatprep.subr.bf16.mxu0 %v2039_v62  ;;  %843 = vmatprep.subr.bf16.mxu1 %v2051_v6  ;;  %v2135_v62 = vld [vmem:[#allocation4 + $0x3a8] ss:$16 sps:$4 sm:$0xff]   ;;  %v2149_v6 = vld [vmem:[#allocation4 + $0x3ec] ss:$16 sps:$4 sm:$0xff]  }
  0x8c   : > { %803 = vmatpush1.bf16.msra.mxu0 %v2043_v2  ;;  %844 = vmatpush1.bf16.msra.mxu1 %v2053_v9  ;;  %v2138_v2 = vld [vmem:[#allocation4 + $0x3c0] ss:$16 sps:$4 sm:$0xff]   ;;  %v2147_v9 = vld [vmem:[#allocation4 + $0x3e8] ss:$16 sps:$4 sm:$0xff]  }
  0x8d   : > { %1292 = vmatprep.subr.bf16.mxu0 %v2056_v5  ;;  %1333 = vmatprep.subr.bf16.mxu1 %v2059_v11  ;;  %v2146_v5 = vld [vmem:[#allocation4 + $0x3e4] ss:$16 sps:$4 sm:$0xff]  }
  0x8f   : > { %805 = vmatmul.mubr.bf16.vlgmr.msra.gmra.mrb[0].mxu0 %v364_v8  ;;  %846 = vmatmul.mubr.bf16.vlgmr.msra.gmra.mrb[0].mxu1 %v364_v8  ;;  %v2144_v8 = vld [vmem:[#allocation4 + $0x3e0] ss:$16 sps:$4 sm:$0xff]  }
  0x90   : > { %1293 = vmatpush1.bf16.msra.mxu0 %v2054_v7  ;;  %1334 = vmatpush1.bf16.msra.mxu1 %v2057_v13  ;;  %v883_v7 = vpack.c.bf16 %v880_v4, %v880_v4  ;;  %v430_v13 = vld [vmem:[%s2744_s3] ss:$2 sm:$0xf]  ;;  %v2173_v4 = vld [vmem:[%s2747_s6 + $0x74] ss:$8 sps:$4 sm:$0xff]  }
  0x91   : > { %1294 = vmatprep.subr.bf16.mxu0 %v2062_v10  ;;  %1335 = vmatprep.subr.bf16.mxu1 %v2065_v15  ;;  %v752_v10 = vlaneseq }
  0x92   : > { %1324 = vmatprep.mubr.bf16.mxu0 %v883_v7  ;;  %1365 = vmatprep.mubr.bf16.mxu1 %v883_v7 }
  0x93   : > { %v2558_v11 = vshrl.u32 %v752_v10, 7 }
  0x94   : > { %1295 = vmatpush1.bf16.msra.mxu0 %v2060_v12  ;;  %1336 = vmatpush1.bf16.msra.mxu1 %v2063_v17 }
  0x95   : > { %1296 = vmatprep.subr.bf16.mxu0 %v2068_v14  ;;  %1337 = vmatprep.subr.bf16.mxu1 %v2071_v19  ;;  %v2561_v12 = vsub.s32 0, %v2558_v11  ;;  %v2567_v14 = vsub.s32 1, %v2558_v11  ;;  %v766_v17 = vsub.s32 3, %v2558_v11 }
  0x97   : > { %v755_v15 = vrot.slane %v430_v13, %v2561_v12 }
  0x98   : > { %1297 = vmatpush1.bf16.msra.mxu0 %v2066_v16  ;;  %1338 = vmatpush1.bf16.msra.mxu1 %v2069_v21  ;;  %v759_v16 = vrot.slane %v430_v13, %v2567_v14 }
  0x99   : > { %1298 = vmatprep.subr.bf16.mxu0 %v2074_v18  ;;  %1339 = vmatprep.subr.bf16.mxu1 %v2077_v22 }
  0x9c   : > { %1299 = vmatpush1.bf16.msra.mxu0 %v2072_v20  ;;  %1340 = vmatpush1.bf16.msra.mxu1 %v2075_v23 }
  0x9d   : > { %1300 = vmatprep.subr.bf16.mxu0 %v2080_v24  ;;  %1341 = vmatprep.subr.bf16.mxu1 %v2083_v25  ;;  %v767_v25 = vrot.slane %v430_v13, %v766_v17 }
  0xa0   : > { %1301 = vmatpush1.bf16.msra.mxu0 %v2078_v26  ;;  %1342 = vmatpush1.bf16.msra.mxu1 %v2081_v27  ;;  %v762_v27 = vsub.s32 2, %v2558_v11 }
  0xa1   : > { %1302 = vmatprep.subr.bf16.mxu0 %v2086_v28  ;;  %1343 = vmatprep.subr.bf16.mxu1 %v2089_v29 }
  0xa4   : > { %1303 = vmatpush1.bf16.msra.mxu0 %v2084_v30  ;;  %1344 = vmatpush1.bf16.msra.mxu1 %v2087_v31 }
  0xa5   : > { %1304 = vmatprep.subr.bf16.mxu0 %v2092_v32  ;;  %1345 = vmatprep.subr.bf16.mxu1 %v2095_v33  ;;  %v763_v32 = vrot.slane %v430_v13, %v762_v27 }
  0xa8   : > { %1305 = vmatpush1.bf16.msra.mxu0 %v2090_v34  ;;  %1346 = vmatpush1.bf16.msra.mxu1 %v2093_v35 }
  0xa9   : > { %1306 = vmatprep.subr.bf16.mxu0 %v2098_v36  ;;  %1347 = vmatprep.subr.bf16.mxu1 %v2101_v37 }
  0xac   : > { %1307 = vmatpush1.bf16.msra.mxu0 %v2096_v38  ;;  %1348 = vmatpush1.bf16.msra.mxu1 %v2099_v39 }
  0xad   : > { %1308 = vmatprep.subr.bf16.mxu0 %v2104_v40  ;;  %1349 = vmatprep.subr.bf16.mxu1 %v2107_v41 }
  0xb0   : > { %1309 = vmatpush1.bf16.msra.mxu0 %v2102_v42  ;;  %1350 = vmatpush1.bf16.msra.mxu1 %v2105_v43  ;;  %v363_v42 = vld [vmem:[#allocation10] sm:$0x1] }
  0xb1   : > { %1310 = vmatprep.subr.bf16.mxu0 %v2110_v44  ;;  %1351 = vmatprep.subr.bf16.mxu1 %v2113_v45 }
  0xb4   : > { %1311 = vmatpush1.bf16.msra.mxu0 %v2108_v46  ;;  %1352 = vmatpush1.bf16.msra.mxu1 %v2111_v47 }
  0xb5   : > { %1312 = vmatprep.subr.bf16.mxu0 %v2116_v48  ;;  %1353 = vmatprep.subr.bf16.mxu1 %v2119_v49 }
  0xb8   : > { %1313 = vmatpush1.bf16.msra.mxu0 %v2114_v50  ;;  %1354 = vmatpush1.bf16.msra.mxu1 %v2117_v51 }
  0xb9   : > { %1314 = vmatprep.subr.bf16.mxu0 %v2122_v52  ;;  %1355 = vmatprep.subr.bf16.mxu1 %v2125_v53  ;;  %v2152_v53 = vld [vmem:[%s2747_s6 + $0x4] ss:$8 sps:$4 sm:$0xff]  }
  0xbc   : > { %1315 = vmatpush1.bf16.msra.mxu0 %v2120_v54  ;;  %1356 = vmatpush1.bf16.msra.mxu1 %v2123_v55  ;;  %v2150_v54 = vld [vmem:[%s2747_s6] ss:$8 sps:$4 sm:$0xff]   ;;  %v2155_v55 = vld [vmem:[%s2747_s6 + $0x14] ss:$8 sps:$4 sm:$0xff]  }
  0xbd   : > { %1316 = vmatprep.subr.bf16.mxu0 %v2128_v56  ;;  %1357 = vmatprep.subr.bf16.mxu1 %v2131_v57  ;;  %v2153_v56 = vld [vmem:[%s2747_s6 + $0x10] ss:$8 sps:$4 sm:$0xff]   ;;  %v2158_v57 = vld [vmem:[%s2747_s6 + $0x24] ss:$8 sps:$4 sm:$0xff]  }
  0xc0   : > { %1317 = vmatpush1.bf16.msra.mxu0 %v2126_v58  ;;  %1358 = vmatpush1.bf16.msra.mxu1 %v2129_v59  ;;  %v2156_v58 = vld [vmem:[%s2747_s6 + $0x20] ss:$8 sps:$4 sm:$0xff]   ;;  %v2161_v59 = vld [vmem:[%s2747_s6 + $0x34] ss:$8 sps:$4 sm:$0xff]  }
  0xc1   : > { %1318 = vmatprep.subr.bf16.mxu0 %v2134_v61  ;;  %1359 = vmatprep.subr.bf16.mxu1 %v2137_v63  ;;  %v2164_v61 = vld [vmem:[%s2747_s6 + $0x44] ss:$8 sps:$4 sm:$0xff]   ;;  %v2167_v63 = vld [vmem:[%s2747_s6 + $0x54] ss:$8 sps:$4 sm:$0xff]  }
  0xc4   : > { %1319 = vmatpush1.bf16.msra.mxu0 %v2132_v60  ;;  %1360 = vmatpush1.bf16.msra.mxu1 %v2135_v62  ;;  %v2159_v60 = vld [vmem:[%s2747_s6 + $0x30] ss:$8 sps:$4 sm:$0xff]   ;;  %v2162_v62 = vld [vmem:[%s2747_s6 + $0x40] ss:$8 sps:$4 sm:$0xff]  }
  0xc5   : > { %1320 = vmatprep.subr.bf16.mxu0 %v2140_v0  ;;  %1361 = vmatprep.subr.bf16.mxu1 %v2143_v1  ;;  %v2165_v0 = vld [vmem:[%s2747_s6 + $0x50] ss:$8 sps:$4 sm:$0xff]   ;;  %v2170_v1 = vld [vmem:[%s2747_s6 + $0x64] ss:$8 sps:$4 sm:$0xff]  }
  0xc8   : > { %1321 = vmatpush1.bf16.msra.mxu0 %v2138_v2  ;;  %1362 = vmatpush1.bf16.msra.mxu1 %v2141_v3  ;;  %v2382_v2 = vmov 0   ;;  %v2168_v3 = vld [vmem:[%s2747_s6 + $0x60] ss:$8 sps:$4 sm:$0xff]  }
  0xc9   : > { %1322 = vmatprep.subr.bf16.mxu0 %v2146_v5  ;;  %1363 = vmatprep.subr.bf16.mxu1 %v2149_v6  ;;  %v2171_v5 = vld [vmem:[%s2747_s6 + $0x70] ss:$8 sps:$4 sm:$0xff]   ;;  %v1795_v6 = vld [vmem:[%s2744_s3 + $0x1] ss:$2 sm:$0xf] }
  0xca   : > { %v1275_v7 = vrot.slane %v1795_v6, %v2561_v12 }
  0xcc   : > { %1323 = vmatpush1.bf16.msra.mxu0 %v2144_v8  ;;  %1364 = vmatpush1.bf16.msra.mxu1 %v2147_v9  ;;  %v1279_v8 = vrot.slane %v1795_v6, %v2567_v14 }
  0xcd   : > { %1509 = vmatprep.subr.bf16.mxu0 %v2152_v53 }
 0x162   : > { %v806_v18 = vpop.f32.mrb[0].mxu0  ;;  %v847_v28 = vpop.f32.mrb[0].mxu1 }
 0x163   : > { %v807_v19 = vadd.f32 %v806_v18, %v755_v15  ;;  %v808_v20 = vpop.f32.mrb[1].mxu0  ;;  %v849_v29 = vpop.f32.mrb[1].mxu1  ;;  %v848_v35 = vadd.f32 %v847_v28, %v763_v32 }
 0x164   : > { %v809_v21 = vadd.f32 %v808_v20, %v759_v16  ;;  %v810_v22 = vpop.f32.mrb[2].mxu0  ;;  %v850_v30 = vadd.f32 %v849_v29, %v767_v25  ;;  %v851_v31 = vpop.f32.mrb[2].mxu1  ;;  %v1283_v29 = vrot.slane %v1795_v6, %v762_v27 }
 0x165   : > { %v1792_v23 = vmul.f32 -1.442695, %v807_v19  ;;  %v811_v24 = vpop.f32.mrb[3].mxu0  ;;  %v852_v33 = vpop.f32.mrb[3].mxu1 }
 0x166   : > { %v1793_v26 = vmul.f32 -1.442695, %v809_v21  ;;  %v1794_v34 = vmul.f32 -1.442695, %v850_v30 }
 0x167   : > { %2174 = vpow2.f32 %v1792_v23 }
 0x168   : > { %2176 = vpow2.f32 %v1793_v26  ;;  %v1287_v26 = vrot.slane %v1795_v6, %v766_v17 }
 0x169   : > { %2178 = vpow2.f32 %v1794_v34 }
 0x16a   : > { %2180 = vtanh.f32 %v848_v35 }
 0x171   : > { %v2175_v36 = vpop.eup %2174 }
 0x172   : > { %v2177_v37 = vpop.eup %2176  ;;  %v857_v38 = vadd.f32 1.0, %v2175_v36 }
 0x173   : > { %v863_v39 = vadd.f32 1.0, %v2177_v37  ;;  %v2179_v40 = vpop.eup %2178 }
 0x174   : > { %2182 = vrcp.f32 %v857_v38  ;;  %v2181_v41 = vpop.eup %2180  ;;  %v870_v44 = vadd.f32 1.0, %v2179_v40  ;;  %v881_v38 = vld [vmem:[#allocation10 + $0x1] sm:$0x1] }
 0x175   : > { %2184 = vrcp.f32 %v863_v39 }
 0x176   : > { %2186 = vrcp.f32 %v870_v44 }
 0x17e   : > { %v2183_v43 = vpop.eup %2182 }
 0x17f   : > { %v2185_v45 = vpop.eup %2184  ;;  %v874_v46 = vmul.f32 %v2183_v43, %v2181_v41 }
 0x180   : > { %v873_v47 = vmul.f32 %v2185_v45, %v363_v42  ;;  %v2187_v49 = vpop.eup %2186 }
 0x182   : > { %v875_v48 = vadd.f32 %v874_v46, %v873_v47  ;;  %v1417_v47 = vld [vmem:[%s2748_s7] sm:$0x3] }
 0x184   : > { %2188 = vtanh.f32 %v875_v48  ;;  %879 = vst [vmem:[#allocation10] sm:$0x1] %v875_v48  ;;  %v1502_v48 = vrot.slane %v1417_v47, %v2561_v12 }
 0x18e   : > { %v2189_v50 = vpop.eup %2188 }
 0x18f   : > { %v877_v51 = vmul.f32 %v2189_v50, %v2187_v49  ;;  %v1506_v49 = vrot.slane %v1417_v47, %v2567_v14 }
 0x191   : > { %v882_v52 = vpack.c.bf16 %v877_v51, %v877_v51  ;;  %878 = vst [vmem:[#allocation8] sm:$0x1] %v877_v51 }
 0x193   : > { %1325 = vmatmul.mubr.bf16.vlgmr.msra.gmra.mrb[4].mxu0 %v882_v52  ;;  %1366 = vmatmul.mubr.bf16.vlgmr.msra.gmra.mrb[4].mxu1 %v882_v52 }
 0x194   : > { %1510 = vmatpush1.bf16.msra.mxu0 %v2150_v54  ;;  %1541 = vmatprep.mubr.bf16.mxu0 %v2382_v2 }
 0x195   : > { %1511 = vmatprep.subr.bf16.mxu0 %v2155_v55 }
 0x198   : > { %1512 = vmatpush1.bf16.msra.mxu0 %v2153_v56 }
 0x199   : > { %1513 = vmatprep.subr.bf16.mxu0 %v2158_v57 }
 0x19c   : > { %1514 = vmatpush1.bf16.msra.mxu0 %v2156_v58 }
 0x19d   : > { %1515 = vmatprep.subr.bf16.mxu0 %v2161_v59 }
 0x1a0   : > { %1516 = vmatpush1.bf16.msra.mxu0 %v2159_v60 }
 0x1a1   : > { %1517 = vmatprep.subr.bf16.mxu0 %v2164_v61 }
 0x1a4   : > { %1518 = vmatpush1.bf16.msra.mxu0 %v2162_v62 }
 0x1a5   : > { %1519 = vmatprep.subr.bf16.mxu0 %v2167_v63 }
 0x1a8   : > { %1520 = vmatpush1.bf16.msra.mxu0 %v2165_v0 }
 0x1a9   : > { %1521 = vmatprep.subr.bf16.mxu0 %v2170_v1 }
 0x1ac   : > { %1522 = vmatpush1.bf16.msra.mxu0 %v2168_v3 }
 0x1ad   : > { %1523 = vmatprep.subr.bf16.mxu0 %v2173_v4 }
 0x1b0   : > { %1524 = vmatpush1.bf16.msra.mxu0 %v2171_v5 }
 0x266   : > { %v1326_v9 = vpop.f32.mrb[4].mxu0  ;;  %v1367_v13 = vpop.f32.mrb[4].mxu1 }
 0x267   : > { %v1327_v15 = vadd.f32 %v1326_v9, %v1275_v7  ;;  %v1328_v16 = vpop.f32.mrb[5].mxu0  ;;  %v1369_v18 = vpop.f32.mrb[5].mxu1  ;;  %v1368_v31 = vadd.f32 %v1367_v13, %v1283_v29 }
 0x268   : > { %v1329_v19 = vadd.f32 %v1328_v16, %v1279_v8  ;;  %v1330_v20 = vpop.f32.mrb[6].mxu0  ;;  %v1371_v21 = vpop.f32.mrb[6].mxu1  ;;  %v1370_v28 = vadd.f32 %v1369_v18, %v1287_v26 }
 0x269   : > { %v1860_v22 = vmul.f32 -1.442695, %v1327_v15  ;;  %v1331_v23 = vpop.f32.mrb[7].mxu0  ;;  %v1372_v24 = vpop.f32.mrb[7].mxu1 }
 0x26a   : > { %v1861_v25 = vmul.f32 -1.442695, %v1329_v19  ;;  %v1862_v30 = vmul.f32 -1.442695, %v1370_v28 }
 0x26b   : > { %2190 = vpow2.f32 %v1860_v22 }
 0x26c   : > { %2192 = vpow2.f32 %v1861_v25 }
 0x26d   : > { %2194 = vpow2.f32 %v1862_v30 }
 0x26e   : > { %2196 = vtanh.f32 %v1368_v31 }
 0x275   : > { %v2191_v32 = vpop.eup %2190 }
 0x276   : > { %v2193_v33 = vpop.eup %2192  ;;  %v1377_v34 = vadd.f32 1.0, %v2191_v32 }
 0x277   : > { %v1383_v35 = vadd.f32 1.0, %v2193_v33  ;;  %v2195_v36 = vpop.eup %2194 }
 0x278   : > { %2198 = vrcp.f32 %v1377_v34  ;;  %v2197_v37 = vpop.eup %2196  ;;  %v1390_v41 = vadd.f32 1.0, %v2195_v36 }
 0x279   : > { %2200 = vrcp.f32 %v1383_v35 }
 0x27a   : > { %2202 = vrcp.f32 %v1390_v41 }
 0x282   : > { %v2199_v17 = vpop.eup %2198 }
 0x283   : > { %v2201_v39 = vpop.eup %2200  ;;  %v1394_v40 = vmul.f32 %v2199_v17, %v2197_v37 }
 0x284   : > { %v1393_v42 = vmul.f32 %v2201_v39, %v881_v38  ;;  %v2203_v27 = vpop.eup %2202 }
 0x286   : > { %v1395_v43 = vadd.f32 %v1394_v40, %v1393_v42 }
 0x288   : > { %2204 = vtanh.f32 %v1395_v43  ;;  %1399 = vst [vmem:[#allocation10 + $0x1] sm:$0x1] %v1395_v43 }
 0x292   : > { %v2205_v44 = vpop.eup %2204 }
 0x293   : > { %v1397_v45 = vmul.f32 %v2205_v44, %v2203_v27 }
 0x295   : > { %v1400_v46 = vpack.c.bf16 %v1397_v45, %v1397_v45  ;;  %1398 = vst [vmem:[#allocation8 + $0x1] sm:$0x1] %v1397_v45 }
 0x297   : > { %1542 = vmatmul.mubr.bf16.vlgmr.msra.gmra.mrb[8].mxu0 %v1400_v46 }
 0x36a   : > { %v1543_v50 = vpop.f32.mrb[8].mxu0 }
 0x36b   : > { %v1544_v51 = vadd.f32 %v1543_v50, %v1502_v48  ;;  %v1545_v52 = vpop.f32.mrb[9].mxu0 }
 0x36c   : > { %v1546_v53 = vadd.f32 %v1545_v52, %v1506_v49  ;;  %v1547_v54 = vpop.f32.mrb[10].mxu0 }
 0x36d   : > { %v1548_v55 = vpop.f32.mrb[11].mxu0  ;;  %v1551_v56 = vsel %vm1550_vm0, %v1544_v51, -inf }
 0x36e   : > { %v1552_v57 = vsel %vm1550_vm0, %v1546_v53, -inf }
 0x36f   : > { %v1553_v58 = vmax.f32 %v1551_v56, %v1552_v57 }
 0x371   : > { %1554 = vmax.xlane.f32.xlu0 %v1553_v58 }
 0x3fe   : > { %v1555_v59 = vpop.xlane.xlu0 %1554 }
 0x3ff   : > { %v2641_v60 = vsub.f32 %v1544_v51, %v1555_v59  ;;  %v1557_v61 = vsub.f32 %v1546_v53, %v1555_v59 }
 0x401   : > { %v1558_v12 = vmul.f32 1.442695, %v2641_v60  ;;  %v1560_v14 = vmul.f32 1.442695, %v1557_v61 }
 0x403   : > { %2206 = vpow2.f32 %v1558_v12 }
 0x404   : > { %2208 = vpow2.f32 %v1560_v14 }
 0x40d   : > { %v2207_v62 = vpop.eup %2206 }
 0x40e   : > { %v2209_v63 = vpop.eup %2208  ;;  %v1562_v0 = vsel %vm1550_vm0, %v2207_v62, 0.0 }
 0x40f   : > { %v1563_v1 = vsel %vm1550_vm0, %v2209_v63, 0.0 }
 0x410   : > { %v1564_v2 = vadd.f32 %v1563_v1, %v1562_v0 }
 0x412   : > { %1565 = vadd.xlane.f32.xlu0 %v1564_v2 }
 0x413   : > { %2265 = shalt.err (!%p2262_p13)
}
 0x414   : > { %s2266_s25 = scalar_lea.hbm %s2750_s9, 32  ;;  %p2766_p5 = pmov %p2765_p1 }
 0x415   : > { %p2267_p3 = scmp.ne.s32.totalorder %s2750_s9, %s2266_s25  ;;  %p2272_p10 = scmp.lt.u32.totalorder %s2266_s25, %s2750_s9 }
 0x417   : > { %p2268_p8 = pnand %p2267_p3, %p2766_p5 }
 0x419   : > { %p2269_p7 = pneg %p2268_p8 }
 0x41b   : > { %p2274_p11 = pnand %p2272_p10, %p2269_p7 }
 0x41d   : > { %2277 = shalt.err (!%p2274_p11)
}
 0x41e   : > { %p2767_p0 = pmov %p2765_p1  ;;  %s2384_s11 = smov [#allocation10]  }
 0x41f   : > { %s1631_s22 = sshll.u32 %s2384_s11, 4  ;;  %s1632_s22 = int_to_ptr.vmem [resolvable:$true] %s1631_s22 }
 0x420   : > { %1895 = dma.vmem_to_hbm [thread:$0]  (%p2767_p0), %s1621_s17, 32, %s2750_s9, [#allocation9]  }
 0x421   : > { %s2278_s30 = scalar_lea.vmem %s1632_s22, 32  ;;  %p2768_p2 = pmov %p2767_p0 }
 0x422   : > { %p2279_p1 = scmp.ne.s32.totalorder %s1632_s22, %s2278_s30  ;;  %p2285_p9 = scmp.lt.s32.totalorder %s1632_s22, %s1632_s22 }
 0x423   : > { %p2286_p12 = scmp.lt.s32.totalorder %s2278_s30, %s2278_s30 }
 0x424   : > { %p2280_p4 = pnand %p2279_p1, %p2768_p2 }
 0x425   : > { %p2287_p13 = por %p2286_p12, %p2285_p9 }
 0x426   : > { %p2281_p6 = pneg %p2280_p4 }
 0x428   : > { %p2288_p3 = pnand %p2287_p13, %p2281_p6 }
 0x42a   : > { %2291 = shalt.err (!%p2288_p3)
}
 0x42b   : > { %s2292_s14 = scalar_lea.hbm %s2751_s10, 32  ;;  %p2769_p8 = pmov %p2767_p0 }
 0x42c   : > { %p2293_p5 = scmp.ne.s32.totalorder %s2751_s10, %s2292_s14  ;;  %p2298_p11 = scmp.lt.u32.totalorder %s2292_s14, %s2751_s10 }
 0x42e   : > { %p2294_p7 = pnand %p2293_p5, %p2769_p8 }
 0x430   : > { %p2295_p10 = pneg %p2294_p7 }
 0x432   : > { %p2300_p0 = pnand %p2298_p11, %p2295_p10 }
 0x434   : > { %2303 = shalt.err (!%p2300_p0)
}
 0x435   : > { %p2770_p1 = pmov %p2768_p2  ;;  %v2385_v4 = vmov 1966171168   ;;  %s1888_s25 = sshll.u32 %s2466_s21, 5  ;;  %vm1591_vm1 = vcmp.lt.s32.totalorder %v752_v10, 256 }
 0x436   : > { %v1575_v5 = vunpack.c.l.s4 %v2385_v4  ;;  %s1609_s13 = sshll.u32 %s340_s24, 4  ;;  %s2691_s16 = scalar_lea.hbm %s2749_s8, %s1888_s25  ;;  %s2693_s13 = int_to_ptr.vmem [resolvable:$true] %s1609_s13 }
 0x437   : > { %1897 = dma.vmem_to_hbm [thread:$0]  (%p2770_p1), %s1632_s22, 32, %s2751_s10, [#allocation9]  }
 0x438   : > { %v1576_v6 = vunpack.c.0.s8 %v1575_v5  ;;  %s2771_s17 = sand.u32 1, %s2368_s0   ;;  %s2304_s15 = scalar_lea.vmem %s2693_s13, 32 }
 0x439   : > { %s1595_s29 = scalar_lea.sflag [#allocation6], %s2771_s17  ;;  %p2305_p2 = scmp.ne.s32.totalorder %s2693_s13, %s2304_s15 }
 0x43a   : > { %v1579_v15 = vsub.s32 %v1576_v6, %v2558_v11  ;;  %p2772_p4 = scmp.ne.s32.totalorder %s2757_s27, 0  ;;  %s2386_s11 = smov [#allocation7]  }
 0x43b   : > { %s2308_s30 = sshll.u32 %s2386_s11, 4  ;;  %s2309_s30 = int_to_ptr.vmem [resolvable:$false] %s2308_s30 }
 0x43c   : > { %p2306_p6 = pnand %p2305_p2, %p2772_p4  ;;  %s2310_s22 = scalar_lea.vmem %s2309_s30, 64 }
 0x43d   : > { %p2311_p12 = scmp.lt.s32.totalorder %s2693_s13, %s2309_s30  ;;  %p2312_p13 = scmp.lt.s32.totalorder %s2310_s22, %s2304_s15 }
 0x43e   : > { %p2307_p9 = pneg %p2306_p6 }
 0x43f   : > { %p2313_p3 = por %p2312_p13, %p2311_p12 }
 0x441   : > { %p2314_p5 = pnand %p2313_p3, %p2307_p9 }
 0x49f   : > { %v1566_v3 = vpop.xlane.xlu0 %1565 }
 0x4a0   : > { %2210 = vlog2.f32 %v1566_v3 }
 0x4aa   : > { %v2211_v7 = vpop.eup %2210 }
 0x4ab   : > { %v1568_v8 = vmul.f32 0.6931472, %v2211_v7 }
 0x4ad   : > { %v1569_v9 = vsub.f32 %v2641_v60, %v1568_v8  ;;  %v1570_v13 = vsub.f32 %v1557_v61, %v1568_v8 }
 0x4af   : > { %v1573_v16 = vcombine.low %v1569_v9, %v1570_v13 }
 0x4b1   : > { %v1580_v18 = vrot.slane %v1573_v16, %v1579_v15 }
 0x4b3   : > { %v1587_v19 = vrot.slane %v1580_v18, %v1579_v15 }
 0x4b5   : > { %1593 = vst.msk [vmem:[%s340_s24] sm:$0x3] %vm1591_vm1, %v1587_v19 }
 0x4b6   : > { %2317 = shalt.err (!%p2314_p5)
}
 0x4b7   : > { %s2318_s12 = scalar_lea.hbm %s2691_s16, 32  ;;  %s2322_s14 = scalar_lea.hbm %s2749_s8, 192 }
 0x4b8   : > { %p2319_p8 = scmp.ne.s32.totalorder %s2691_s16, %s2318_s12  ;;  %p2323_p11 = scmp.lt.u32.totalorder %s2691_s16, %s2749_s8 }
 0x4b9   : > { %p2324_p0 = scmp.lt.u32.totalorder %s2322_s14, %s2318_s12  ;;  %p2326_p2 = scmp.lt.u32.totalorder %s2318_s12, %s2691_s16 }
 0x4ba   : > { %p2320_p7 = pnand %p2319_p8, %p2772_p4 }
 0x4bb   : > { %p2325_p1 = por %p2324_p0, %p2323_p11 }
 0x4bc   : > { %p2321_p10 = pneg %p2320_p7 }
 0x4bd   : > { %p2327_p6 = por %p2326_p2, %p2325_p1 }
 0x4bf   : > { %p2328_p9 = pnand %p2327_p6, %p2321_p10 }
 0x4c1   : > { %2331 = shalt.err (!%p2328_p9)
}
 0x4c2   : > { %1893 = dma.vmem_to_hbm [thread:$0]  (%p2772_p4), %s2693_s13, 32, %s2691_s16, %s1595_s29  }
 0x4c3   : > { %p2773_p12 = scmp.eq.s32.totalorder %s2466_s21, 5 }
 0x4c5   : > { %2355 = dma.done.wait (%p2773_p12), [#allocation9], 64   ;;  %p2774_p13 = pmov %p2773_p12 }
 0x4c7   : > { %2357 = vsyncadd (%p2774_p13), [#allocation9], 4294967232 }
 0x4c8 PF: > { %p1917_p3 = scmp.ge.s32.totalorder %s2376_s20, 2  ;;  %s1651_s15 = sand.u32 1, %s2364_s18  }
 0x4c9   : > { %p2775_p5 = scmp.ne.s32.totalorder %s2758_s28, 0  ;;  %s1652_s30 = scalar_lea.sflag [#allocation6], %s1651_s15 }
 0x4cb   : > { %p1908_p8 = pnand %p1917_p3, %p2775_p5 }
 0x4cd   : > { %2359 = dma.done.wait (!%p1908_p8), %s1652_s30, 32  }
 0x4ce   : > { %2361 = vsyncadd (!%p1908_p8), %s1652_s30, 4294967264  ;;  %p29_p4 = scmp.ge.s32.totalorder %s2470_s23, 8   ;;  %s2776_s18 = smov %s2368_s0 }
 0x4cf   : > { %s2777_s0 = smov %s2372_s19  ;;  %s2778_s19 = smov %s2481_s26 }
 0x4d0   : > { %s2779_s20 = smov %s2470_s23  ;;  %31 = sbr.rel (!%p29_p4) target bundleno = 20 (0x14), region = 110 }
 0x4d7   :  { %1657 = vsyncpa [#allocation5], 1 }
 0x4d8   :  { %1659 = vsyncpa [#allocation5 + $0x1], 1 }
 0x4d9   :  { %1660 = vsyncpa [#allocation6], 1 }
 0x4da   :  { %1662 = vsyncpa [#allocation6 + $0x1], 1 }
 0x4db   :  { %1663 = vsyncpa [#allocation9], 1 }

</bundles_post_ra>
